<compile_context>
chip_gen: v5e
topology: v5e:2x2
jax: 0.10.0
libtpu: 0.0.40
codegen_flags: <defaults>
</compile_context>

<pallas_src>
import functools

import jax
import jax.numpy as jnp
from jax.experimental import pallas as pl
from jax.experimental.pallas import tpu as pltpu

NEG_SLOPE = 0.01  # PyTorch nn.LeakyReLU default


def _leaky_relu(x):
    return jnp.where(x > 0, x, NEG_SLOPE * x)


def discriminator_kernel(x_ref, w1_ref, b1_ref, w2_ref, b2_ref, w3_ref, b3_ref, o_ref):
    # x_ref: [latent_dim, tile]  (batch on lanes -> lane-dense everywhere)
    x = x_ref[...]

    # Linear 1 + LeakyReLU : [hidden, latent] @ [latent, tile] -> [hidden, tile]
    h = jnp.dot(w1_ref[...], x, preferred_element_type=jnp.float32) + b1_ref[...]
    h = _leaky_relu(h)

    # Linear 2 + LeakyReLU : [hidden, hidden] @ [hidden, tile] -> [hidden, tile]
    h = jnp.dot(w2_ref[...], h, preferred_element_type=jnp.float32) + b2_ref[...]
    h = _leaky_relu(h)

    # Linear 3 (logits)    : [out, hidden] @ [hidden, tile] -> [out, tile]
    logits = jnp.dot(w3_ref[...], h, preferred_element_type=jnp.float32) + b3_ref[...]

    # Numerically stable softmax over the OUT axis (sublanes); each XLU/VPU
    # reduction step covers 128 batch columns at once.
    m = jnp.max(logits, axis=0, keepdims=True)          # [1, tile]
    e = jnp.exp(logits - m)                              # [out, tile]
    denom = jnp.sum(e, axis=0, keepdims=True)            # [1, tile]
    o_ref[...] = (e * pl.reciprocal(denom, approx=False)).astype(o_ref.dtype)


def _round_up(v, m):
    return ((v + m - 1) // m) * m


@functools.partial(jax.jit, static_argnames=("batch_tile",))
def discriminator_forward(x, params, batch_tile=2048):
    """x: [B, latent_dim] float32. Returns [B, output_size] float32."""
    w1, b1, w2, b2, w3, b3 = params          # PyTorch layout: W [out, in], b [out, 1]
    B, latent_dim = x.shape
    hidden = w1.shape[0]
    out_dim = w3.shape[0]

    x_t = x.T                                 # [latent_dim, B]  (batch on lanes)

    if B <= batch_tile:
        # Single step: no grid/pipeline overhead at all (best on v5e/v6e).
        tile = B
        grid = (1,)
    else:
        # Even number of steps (balanced across v7x's 2 TCs), lane-aligned tile.
        n_steps = max(2, pl.cdiv(B, batch_tile))
        if n_steps % 2:
            n_steps += 1
        tile = _round_up(pl.cdiv(B, n_steps), 128)
        grid = (pl.cdiv(B, tile),)

    full = lambda i: (0, 0)  # weights/biases resident across all grid steps
    out_t = pl.pallas_call(
        discriminator_kernel,
        out_shape=jax.ShapeDtypeStruct((out_dim, B), jnp.float32),
        grid_spec=pltpu.PrefetchScalarGridSpec(
            num_scalar_prefetch=0,
            grid=grid,
            in_specs=[
                pl.BlockSpec((latent_dim, tile), lambda i: (0, i)),
                pl.BlockSpec((hidden, latent_dim), full),
                pl.BlockSpec((hidden, 1), full),
                pl.BlockSpec((hidden, hidden), full),
                pl.BlockSpec((hidden, 1), full),
                pl.BlockSpec((out_dim, hidden), full),
                pl.BlockSpec((out_dim, 1), full),
            ],
            out_specs=pl.BlockSpec((out_dim, tile), lambda i: (0, i)),
        ),
        compiler_params=pltpu.CompilerParams(
            dimension_semantics=("parallel",)
        ),
    )(x_t, w1, b1, w2, b2, w3, b3)

    return out_t.T                            # [B, out_dim]


def init_params(key, latent_dim, hidden_size, output_size):
    """Deterministic synthetic init; shapes match nn.Linear ([out, in], bias [out, 1])."""
    ks = jax.random.split(key, 6)

    def lin(kw, kb, fan_in, fan_out):
        bound = 1.0 / jnp.sqrt(fan_in)
        w = jax.random.uniform(kw, (fan_out, fan_in), jnp.float32, -bound, bound)
        b = jax.random.uniform(kb, (fan_out, 1), jnp.float32, -bound, bound)
        return w, b

    w1, b1 = lin(ks[0], ks[1], latent_dim, hidden_size)
    w2, b2 = lin(ks[2], ks[3], hidden_size, hidden_size)
    w3, b3 = lin(ks[4], ks[5], hidden_size, output_size)
    return (w1, b1, w2, b2, w3, b3)


def reference_forward(x, params):
    w1, b1, w2, b2, w3, b3 = params
    h = x @ w1.T + b1.T
    h = jnp.where(h > 0, h, NEG_SLOPE * h)
    h = h @ w2.T + b2.T
    h = jnp.where(h > 0, h, NEG_SLOPE * h)
    logits = h @ w3.T + b3.T
    return jax.nn.softmax(logits, axis=-1)


if __name__ == "__main__":
    latent_dim, hidden_size, output_size = 16, 32, 8

    key = jax.random.PRNGKey(0)
    kx, kp, kx2 = jax.random.split(key, 3)
    params = init_params(kp, latent_dim, hidden_size, output_size)

    # --- Small batch: exercises the grid=(1,) single-invocation path ---------
    batch = 16
    x = jax.random.normal(kx, (batch, latent_dim), jnp.float32)
    out = discriminator_forward(x, params)
    out = jax.block_until_ready(out)

    ref = reference_forward(x, params)
    assert out.shape == (batch, output_size)
    assert jnp.allclose(out, ref, atol=1e-5, rtol=1e-5), "mismatch vs reference (small B)"
    assert jnp.allclose(jnp.sum(out, axis=-1), 1.0, atol=1e-5), "softmax rows must sum to 1"

    # --- Larger batch: exercises the tiled, even-step, padded-last-tile path -
    batch2 = 4500  # -> 4 lane-aligned tiles of 1152 cols, last tile padded (benign)
    x2 = jax.random.normal(kx2, (batch2, latent_dim), jnp.float32)
    out2 = discriminator_forward(x2, params, batch_tile=2048)
    out2 = jax.block_until_ready(out2)

    ref2 = reference_forward(x2, params)
    assert out2.shape == (batch2, output_size)
    assert jnp.allclose(out2, ref2, atol=1e-5, rtol=1e-5), "mismatch vs reference (large B)"
    assert jnp.allclose(jnp.sum(out2, axis=-1), 1.0, atol=1e-5), "softmax rows must sum to 1"

    print("KERNEL_OK")
</pallas_src>

<mosaic_0001>
module attributes {stable_mosaic.version = 11 : i64} {
  func.func @discriminator_kernel(%arg0: i32, %arg1: memref<16x16xf32, #tpu.memory_space<vmem>>, %arg2: memref<32x16xf32, #tpu.memory_space<vmem>>, %arg3: memref<32x1xf32, #tpu.memory_space<vmem>>, %arg4: memref<32x32xf32, #tpu.memory_space<vmem>>, %arg5: memref<32x1xf32, #tpu.memory_space<vmem>>, %arg6: memref<8x32xf32, #tpu.memory_space<vmem>>, %arg7: memref<8x1xf32, #tpu.memory_space<vmem>>, %arg8: memref<8x16xf32, #tpu.memory_space<vmem>>) attributes {dimension_semantics = [#tpu.dimension_semantics<parallel>], iteration_bounds = array<i64: 1>, scalar_prefetch = 0 : i64, scratch_operands = 0 : i64, tpu.core_type = #tpu.core_type<tc>, window_params = [{transform_indices = @transform_0, window_bounds = array<i64: 16, 16>}, {pipeline_mode = #tpu.pipeline_mode<synchronous>, transform_indices = @transform_1, window_bounds = array<i64: 32, 16>}, {pipeline_mode = #tpu.pipeline_mode<synchronous>, transform_indices = @transform_2, window_bounds = array<i64: 32, 1>}, {pipeline_mode = #tpu.pipeline_mode<synchronous>, transform_indices = @transform_3, window_bounds = array<i64: 32, 32>}, {pipeline_mode = #tpu.pipeline_mode<synchronous>, transform_indices = @transform_4, window_bounds = array<i64: 32, 1>}, {pipeline_mode = #tpu.pipeline_mode<synchronous>, transform_indices = @transform_5, window_bounds = array<i64: 8, 32>}, {pipeline_mode = #tpu.pipeline_mode<synchronous>, transform_indices = @transform_6, window_bounds = array<i64: 8, 1>}, {transform_indices = @transform_7, window_bounds = array<i64: 8, 16>}]} {
    %c0 = arith.constant 0 : index
    %c0_0 = arith.constant 0 : index
    %0 = vector.load %arg1[%c0, %c0_0] : memref<16x16xf32, #tpu.memory_space<vmem>>, vector<16x16xf32>
    %c0_1 = arith.constant 0 : index
    %c0_2 = arith.constant 0 : index
    %1 = vector.load %arg2[%c0_1, %c0_2] : memref<32x16xf32, #tpu.memory_space<vmem>>, vector<32x16xf32>
    %cst = arith.constant dense<0.000000e+00> : vector<32x16xf32>
    %2 = tpu.matmul %1, %0, %cst {dimension_numbers = #tpu.dot_dimension_numbers<[1], [0], [0], [1], [0, 0, 1, 1], [], []>} : vector<32x16xf32>, vector<16x16xf32>, vector<32x16xf32> -> vector<32x16xf32>
    %c0_3 = arith.constant 0 : index
    %c0_4 = arith.constant 0 : index
    %3 = vector.load %arg3[%c0_3, %c0_4] : memref<32x1xf32, #tpu.memory_space<vmem>>, vector<32x1xf32>
    %4 = vector.broadcast %3 : vector<32x1xf32> to vector<32x16xf32>
    %5 = arith.addf %2, %4 : vector<32x16xf32>
    %cst_5 = arith.constant 0.000000e+00 : f32
    %6 = vector.broadcast %cst_5 : f32 to vector<32x16xf32>
    %7 = arith.cmpf ogt, %5, %6 : vector<32x16xf32>
    %cst_6 = arith.constant 0.00999999977 : f32
    %8 = vector.broadcast %cst_6 : f32 to vector<32x16xf32>
    %9 = arith.mulf %8, %5 : vector<32x16xf32>
    %10 = arith.select %7, %5, %9 : vector<32x16xi1>, vector<32x16xf32>
    %c0_7 = arith.constant 0 : index
    %c0_8 = arith.constant 0 : index
    %11 = vector.load %arg4[%c0_7, %c0_8] : memref<32x32xf32, #tpu.memory_space<vmem>>, vector<32x32xf32>
    %cst_9 = arith.constant dense<0.000000e+00> : vector<32x16xf32>
    %12 = tpu.matmul %11, %10, %cst_9 {dimension_numbers = #tpu.dot_dimension_numbers<[1], [0], [0], [1], [0, 0, 1, 1], [], []>} : vector<32x32xf32>, vector<32x16xf32>, vector<32x16xf32> -> vector<32x16xf32>
    %c0_10 = arith.constant 0 : index
    %c0_11 = arith.constant 0 : index
    %13 = vector.load %arg5[%c0_10, %c0_11] : memref<32x1xf32, #tpu.memory_space<vmem>>, vector<32x1xf32>
    %14 = vector.broadcast %13 : vector<32x1xf32> to vector<32x16xf32>
    %15 = arith.addf %12, %14 : vector<32x16xf32>
    %cst_12 = arith.constant 0.000000e+00 : f32
    %16 = vector.broadcast %cst_12 : f32 to vector<32x16xf32>
    %17 = arith.cmpf ogt, %15, %16 : vector<32x16xf32>
    %cst_13 = arith.constant 0.00999999977 : f32
    %18 = vector.broadcast %cst_13 : f32 to vector<32x16xf32>
    %19 = arith.mulf %18, %15 : vector<32x16xf32>
    %20 = arith.select %17, %15, %19 : vector<32x16xi1>, vector<32x16xf32>
    %c0_14 = arith.constant 0 : index
    %c0_15 = arith.constant 0 : index
    %21 = vector.load %arg6[%c0_14, %c0_15] : memref<8x32xf32, #tpu.memory_space<vmem>>, vector<8x32xf32>
    %cst_16 = arith.constant dense<0.000000e+00> : vector<8x16xf32>
    %22 = tpu.matmul %21, %20, %cst_16 {dimension_numbers = #tpu.dot_dimension_numbers<[1], [0], [0], [1], [0, 0, 1, 1], [], []>} : vector<8x32xf32>, vector<32x16xf32>, vector<8x16xf32> -> vector<8x16xf32>
    %c0_17 = arith.constant 0 : index
    %c0_18 = arith.constant 0 : index
    %23 = vector.load %arg7[%c0_17, %c0_18] : memref<8x1xf32, #tpu.memory_space<vmem>>, vector<8x1xf32>
    %24 = vector.broadcast %23 : vector<8x1xf32> to vector<8x16xf32>
    %25 = arith.addf %22, %24 : vector<8x16xf32>
    %cst_19 = arith.constant dense<0xFF800000> : vector<16xf32>
    %26 = vector.multi_reduction <maximumf>, %25, %cst_19 [0] : vector<8x16xf32> to vector<16xf32>
    %27 = vector.shape_cast %26 : vector<16xf32> to vector<1x16xf32>
    %28 = vector.broadcast %27 : vector<1x16xf32> to vector<8x16xf32>
    %29 = arith.subf %25, %28 : vector<8x16xf32>
    %30 = math.exp %29 : vector<8x16xf32>
    %cst_20 = arith.constant dense<0.000000e+00> : vector<16xf32>
    %31 = vector.multi_reduction <add>, %30, %cst_20 [0] : vector<8x16xf32> to vector<16xf32>
    %32 = vector.shape_cast %31 : vector<16xf32> to vector<1x16xf32>
    %33 = tpu.reciprocal %32 : vector<1x16xf32> -> vector<1x16xf32>
    %34 = vector.broadcast %33 : vector<1x16xf32> to vector<8x16xf32>
    %35 = arith.mulf %30, %34 : vector<8x16xf32>
    %c0_21 = arith.constant 0 : index
    %c0_22 = arith.constant 0 : index
    %36 = vector.load %arg8[%c0_21, %c0_22] : memref<8x16xf32, #tpu.memory_space<vmem>>, vector<8x16xf32>
    tpu.vector_store %arg8[%c0_21, %c0_22], %35 {strides = array<i32>} : memref<8x16xf32, #tpu.memory_space<vmem>>, vector<8x16xf32>,
    return
  }
  func.func @transform_0(%arg0: i32) -> (i32, i32) {
    %c0_i32 = arith.constant 0 : i32
    %c0_i32_0 = arith.constant 0 : i32
    return %c0_i32, %arg0 : i32, i32
  }
  func.func @transform_1(%arg0: i32) -> (i32, i32) {
    %c0_i32 = arith.constant 0 : i32
    %c0_i32_0 = arith.constant 0 : i32
    %c0_i32_1 = arith.constant 0 : i32
    return %c0_i32, %c0_i32_0 : i32, i32
  }
  func.func @transform_2(%arg0: i32) -> (i32, i32) {
    %c0_i32 = arith.constant 0 : i32
    %c0_i32_0 = arith.constant 0 : i32
    %c0_i32_1 = arith.constant 0 : i32
    return %c0_i32, %c0_i32_0 : i32, i32
  }
  func.func @transform_3(%arg0: i32) -> (i32, i32) {
    %c0_i32 = arith.constant 0 : i32
    %c0_i32_0 = arith.constant 0 : i32
    %c0_i32_1 = arith.constant 0 : i32
    return %c0_i32, %c0_i32_0 : i32, i32
  }
  func.func @transform_4(%arg0: i32) -> (i32, i32) {
    %c0_i32 = arith.constant 0 : i32
    %c0_i32_0 = arith.constant 0 : i32
    %c0_i32_1 = arith.constant 0 : i32
    return %c0_i32, %c0_i32_0 : i32, i32
  }
  func.func @transform_5(%arg0: i32) -> (i32, i32) {
    %c0_i32 = arith.constant 0 : i32
    %c0_i32_0 = arith.constant 0 : i32
    %c0_i32_1 = arith.constant 0 : i32
    return %c0_i32, %c0_i32_0 : i32, i32
  }
  func.func @transform_6(%arg0: i32) -> (i32, i32) {
    %c0_i32 = arith.constant 0 : i32
    %c0_i32_0 = arith.constant 0 : i32
    %c0_i32_1 = arith.constant 0 : i32
    return %c0_i32, %c0_i32_0 : i32, i32
  }
  func.func @transform_7(%arg0: i32) -> (i32, i32) {
    %c0_i32 = arith.constant 0 : i32
    %c0_i32_0 = arith.constant 0 : i32
    return %c0_i32, %arg0 : i32, i32
  }
}

</mosaic_0001>

<bundles_post_ra>
// kernel: discriminator_forward.1
= control target key start
LH: loop header
LB: loop body
LE: loop exit
PB: predicated region body
PF: predicated region fallthrough
CT: control target
= control target key end

     0   :  { %vm57_vm0 = vcmask 130048   ;;  %v326_v3 = vmov 0   ;;  %s443_s0 = inlined_call_operand.vmem [shape: f32[16,16], index: 0, kind: input, shape index: {}]   ;;  %s444_s1 = inlined_call_operand.vmem [shape: f32[32,16], index: 1, kind: input, shape index: {}]   ;;  %s445_s2 = inlined_call_operand.vmem [shape: f32[32,1], index: 2, kind: input, shape index: {}]   ;;  %s446_s3 = inlined_call_operand.vmem [shape: f32[32,32], index: 3, kind: input, shape index: {}]   ;;  %s447_s4 = inlined_call_operand.vmem [shape: f32[32,1], index: 4, kind: input, shape index: {}]   ;;  %s448_s5 = inlined_call_operand.vmem [shape: f32[8,32], index: 5, kind: input, shape index: {}]   ;;  %s449_s6 = inlined_call_operand.vmem [shape: f32[8,1], index: 6, kind: input, shape index: {}]   ;;  %s450_s7 = inlined_call_operand.hbm [shape: f32[8,16], index: 7, kind: output, shape index: {}]  }
   0x1   :  { %v28_v0 = vld [vmem:[%s443_s0 + $0x8] sm:$0xff]  ;;  %v27_v1 = vld [vmem:[%s443_s0] sm:$0xff]  ;;  %294 = vset.pattern.permute.xlu1 %v326_v3  ;;  %v36_v4 = vld [vmem:[%s445_s2 + $0x18] sm:$0xff]  ;;  %293 = vset.pattern.permute.xlu0 %v326_v3 }
   0x2   :  { %84 = vmatpush.msra.mxu0 %v28_v0  ;;  %v29_v2 = vld [vmem:[%s444_s1] sm:$0xff]  ;;  %v34_v5 = vld [vmem:[%s445_s2 + $0x8] sm:$0xff]  ;;  %54 = vperm.xlu0 %293, %v36_v4   ;;  %v32_v6 = vld [vmem:[%s444_s1 + $0x18] sm:$0xff] }
   0x3   :  { %44 = vperm.xlu1 %294, %v34_v5   ;;  %281 = vmatpush.msra.mxu1 %v28_v0 }
   0x4   :  { %85 = vmatpush.msra.mxu0 %v27_v1 }
   0x5   :  { %272 = vmatmul.msk.f32.vlgmr.msra.gmra.mxu0 %vm57_vm0, %v29_v2 }
   0x6   :  { %12 = vsyncpa [#allocation3], 0  ;;  %295 = vset.pattern.permute.xlu2 %v326_v3  ;;  %282 = vmatpush.msra.mxu1 %v27_v1  ;;  %v33_v7 = vld [vmem:[%s445_s2] sm:$0xff]  ;;  %v35_v8 = vld [vmem:[%s445_s2 + $0x10] sm:$0xff]  ;;  %vm139_vm5 = vcmask 261120   ;;  %s263_s14 = sshll.u32 %s450_s7, 4  ;;  %s264_s14 = int_to_ptr.hbm [resolvable:$true] %s263_s14 }
   0x7   :  { %275 = vmatmul.msk.f32.vlgmr.msra.gmra.mxu1 %vm57_vm0, %v32_v6  ;;  %v30_v9 = vld [vmem:[%s444_s1 + $0x8] sm:$0xff]  ;;  %v115_v10 = vld [vmem:[%s447_s4] sm:$0xff]  ;;  %v31_v12 = vld [vmem:[%s444_s1 + $0x10] sm:$0xff] }
   0x8   :  { %v116_v11 = vld [vmem:[%s447_s4 + $0x8] sm:$0xff]  ;;  %v118_v18 = vld [vmem:[%s447_s4 + $0x18] sm:$0xff]  ;;  %v117_v22 = vld [vmem:[%s447_s4 + $0x10] sm:$0xff] }
   0x9   :  { %136 = vperm.xlu2 %295, %v118_v18   ;;  %v194_v29 = vld [vmem:[%s449_s6] sm:$0xff]  ;;  %v112_v37 = vld [vmem:[%s446_s3 + $0x8] sm:$0xff]  ;;  %v113_v38 = vld [vmem:[%s446_s3 + $0x10] sm:$0xff] }
   0xa   :  { %49 = vperm.xlu0 %293, %v35_v8   ;;  %v111_v35 = vld [vmem:[%s446_s3] sm:$0xff]  ;;  %v114_v39 = vld [vmem:[%s446_s3 + $0x18] sm:$0xff] }
   0xb   :  { %39 = vperm.xlu1 %294, %v33_v7   ;;  %v193_v59 = vld [vmem:[%s448_s5] sm:$0xff]  ;;  %s327_s5 = smov [#allocation2]  }
   0xc   :  { %s261_s11 = sshll.u32 %s327_s5, 4  ;;  %s262_s11 = int_to_ptr.vmem [resolvable:$true] %s261_s11 }
   0xd   :  { %273 = vmatmul.msk.f32.gmra.mxu0 %vm57_vm0, %v30_v9 }
  0x11   :  { %131 = vperm.xlu2 %295, %v117_v22  }
  0x12   :  { %126 = vperm.xlu0 %293, %v116_v11  }
  0x13   :  { %121 = vperm.xlu1 %294, %v115_v10  }
  0x15   :  { %274 = vmatmul.msk.f32.gmra.mxu0 %vm57_vm0, %v31_v12 }
  0x19   :  { %197 = vperm.xlu2 %295, %v194_v29  }
  0x63   :  { %v137_v40 = vpop.permute.xlu2 %136 }
  0x6b   :  { %v132_v42 = vpop.permute.xlu2 %131 }
  0x73   :  { %v198_v61 = vpop.permute.xlu2 %197 }
  0x74   :  { %v55_v14 = vpop.permute.xlu0 %54 }
  0x75   :  { %v45_v16 = vpop.permute.xlu1 %44 }
  0x7c   :  { %v50_v25 = vpop.permute.xlu0 %49 }
  0x7d   :  { %v40_v23 = vpop.permute.xlu1 %39 }
  0x82   :  { %v87_v13 = vpop.f32.mrf.mxu0 }
  0x83   :  { %v88_v27 = vadd.f32 %v87_v13, %v40_v23 }
  0x84   :  { %v96_v15 = vpop.f32.mrf.mxu1  ;;  %v127_v44 = vpop.permute.xlu0 %126 }
  0x85   :  { %v97_v17 = vadd.f32 %v96_v15, %v55_v14  ;;  %v103_v32 = vmul.f32 0.01, %v88_v27  ;;  %vm99_vm4 = vcmp.gt.f32.partialorder %v88_v27, 0.0  ;;  %v122_v50 = vpop.permute.xlu1 %121 }
  0x87   :  { %v106_v19 = vmul.f32 0.01, %v97_v17  ;;  %vm102_vm1 = vcmp.gt.f32.partialorder %v97_v17, 0.0  ;;  %v107_v36 = vsel %vm99_vm4, %v88_v27, %v103_v32 }
  0x89   :  { %v110_v21 = vsel %vm102_vm1, %v97_v17, %v106_v19 }
  0x8a   :  { %v90_v20 = vpop.f32.mrf.mxu0  ;;  %164 = vmatpush.msrb.mxu1 %v110_v21  ;;  %283 = vmatpush.msra.mxu2 %v110_v21 }
  0x8b   :  { %284 = vmatpush.msra.mxu3 %v110_v21  ;;  %v91_v24 = vadd.f32 %v90_v20, %v45_v16 }
  0x8d   :  { %v104_v30 = vmul.f32 0.01, %v91_v24  ;;  %vm100_vm3 = vcmp.gt.f32.partialorder %v91_v24, 0.0 }
  0x8f   :  { %v108_v34 = vsel %vm100_vm3, %v91_v24, %v104_v30 }
  0x92   :  { %v93_v26 = vpop.f32.mrf.mxu0 }
  0x93   :  { %v94_v28 = vadd.f32 %v93_v26, %v50_v25 }
  0x95   :  { %v105_v31 = vmul.f32 0.01, %v94_v28  ;;  %vm101_vm2 = vcmp.gt.f32.partialorder %v94_v28, 0.0 }
  0x97   :  { %v109_v33 = vsel %vm101_vm2, %v94_v28, %v105_v31 }
  0x98   :  { %165 = vmatpush.msrb.mxu1 %v109_v33  ;;  %285 = vmatpush.msra.mxu2 %v109_v33 }
  0x99   :  { %286 = vmatpush.msra.mxu3 %v109_v33 }
  0x9a   :  { %166 = vmatpush.msrb.mxu1 %v108_v34  ;;  %287 = vmatpush.msra.mxu2 %v108_v34 }
  0x9b   :  { %288 = vmatpush.msra.mxu3 %v108_v34 }
  0x9c   :  { %167 = vmatpush.msrb.mxu1 %v107_v36  ;;  %289 = vmatpush.msra.mxu2 %v107_v36 }
  0x9d   :  { %290 = vmatpush.msra.mxu3 %v107_v36  ;;  %276 = vmatmul.msk.f32.vlgmr.msrb.gmra.mxu1 %vm139_vm5, %v111_v35 }
  0x9e   :  { %277 = vmatmul.msk.f32.vlgmr.msra.gmra.mxu2 %vm139_vm5, %v112_v37  ;;  %278 = vmatmul.msk.f32.vlgmr.msra.gmra.mxu3 %vm139_vm5, %v113_v38 }
  0xa6   :  { %279 = vmatmul.msk.f32.gmra.mxu3 %vm139_vm5, %v114_v39 }
 0x11a   :  { %v169_v46 = vpop.f32.mrf.mxu1 }
 0x11b   :  { %v170_v51 = vadd.f32 %v169_v46, %v122_v50 }
 0x11d   :  { %v185_v57 = vmul.f32 0.01, %v170_v51  ;;  %vm181_vm9 = vcmp.gt.f32.partialorder %v170_v51, 0.0 }
 0x11f   :  { %v189_v60 = vsel %vm181_vm9, %v170_v51, %v185_v57 }
 0x121   :  { %v175_v41 = vpop.f32.mrf.mxu3  ;;  %v172_v43 = vpop.f32.mrf.mxu2 }
 0x122   :  { %v176_v45 = vadd.f32 %v175_v41, %v132_v42  ;;  %v173_v48 = vadd.f32 %v172_v43, %v127_v44 }
 0x124   :  { %v187_v53 = vmul.f32 0.01, %v176_v45  ;;  %vm183_vm7 = vcmp.gt.f32.partialorder %v176_v45, 0.0  ;;  %v186_v55 = vmul.f32 0.01, %v173_v48  ;;  %vm182_vm8 = vcmp.gt.f32.partialorder %v173_v48, 0.0 }
 0x126   :  { %v191_v56 = vsel %vm183_vm7, %v176_v45, %v187_v53  ;;  %v190_v58 = vsel %vm182_vm8, %v173_v48, %v186_v55 }
 0x129   :  { %v178_v47 = vpop.f32.mrf.mxu3 }
 0x12a   :  { %v179_v49 = vadd.f32 %v178_v47, %v137_v40 }
 0x12c   :  { %vm184_vm6 = vcmp.gt.f32.partialorder %v179_v49, 0.0  ;;  %v188_v52 = vmul.f32 0.01, %v179_v49 }
 0x12e   :  { %v192_v54 = vsel %vm184_vm6, %v179_v49, %v188_v52 }
 0x12f   :  { %215 = vmatpush.msrb.mxu2 %v192_v54 }
 0x131   :  { %216 = vmatpush.msrb.mxu2 %v191_v56 }
 0x133   :  { %217 = vmatpush.msrb.mxu2 %v190_v58 }
 0x135   :  { %218 = vmatpush.msrb.mxu2 %v189_v60 }
 0x136   :  { %280 = vmatmul.msk.f32.vlgmr.msrb.gmra.mxu2 %vm139_vm5, %v193_v59 }
 0x1b9   :  { %v220_v62 = vpop.f32.mrf.mxu2 }
 0x1ba   :  { %v221_v63 = vadd.f32 %v220_v62, %v198_v61 }
 0x1bc   :  { %v223_v0 = vsel %vm57_vm0, %v221_v63, -inf }
 0x1bd   :  { %v224_v1 = vrot.slane %v223_v0, 4 }
 0x1bf   :  { %v225_v2 = vmax.f32 %v223_v0, %v224_v1 }
 0x1c1   :  { %v226_v3 = vrot.slane %v225_v2, 2 }
 0x1c3   :  { %v227_v4 = vmax.f32 %v225_v2, %v226_v3 }
 0x1c5   :  { %v228_v5 = vrot.slane %v227_v4, 1 }
 0x1c7   :  { %v229_v6 = vmax.f32 %v227_v4, %v228_v5 }
 0x1c9   :  { %v230_v7 = vsub.f32 %v221_v63, %v229_v6 }
 0x1cb   :  { %v231_v8 = vmul.f32 1.442695, %v230_v7 }
 0x1cd   :  { %296 = vpow2.f32 %v231_v8 }
 0x1d3   :  { %v297_v9 = vpop.eup %296 }
 0x1d4   :  { %v233_v10 = vsel %vm57_vm0, %v297_v9, 0.0 }
 0x1d5   :  { %v234_v11 = vrot.slane %v233_v10, 4 }
 0x1d7   :  { %v235_v12 = vadd.f32 %v234_v11, %v233_v10 }
 0x1d9   :  { %v236_v13 = vrot.slane %v235_v12, 2 }
 0x1db   :  { %v237_v14 = vadd.f32 %v236_v13, %v235_v12 }
 0x1dd   :  { %v238_v15 = vrot.slane %v237_v14, 1 }
 0x1df   :  { %v239_v16 = vadd.f32 %v238_v15, %v237_v14 }
 0x1e1   :  { %298 = vrcp.f32 %v239_v16  ;;  %v251_v20 = vand.u32 2147483648, %v239_v16  ;;  %v249_v22 = vand.u32 2147483647, %v239_v16  ;;  %vm245_vm11 = vweird.f32 %v239_v16 }
 0x1e3   :  { %v252_v24 = vor.u32 1.1754944e-38, %v251_v20  ;;  %vm250_vm13 = vcmp.eq.f32.partialorder %v249_v22, 8.507059e+37 }
 0x1e7   :  { %v299_v17 = vpop.eup %298 }
 0x1e8   :  { %v241_v18 = vmul.f32 %v299_v17, %v239_v16  ;;  %vm246_vm10 = vweird.f32 %v299_v17 }
 0x1e9   :  { %vm247_vm12 = vmor %vm245_vm11, %vm246_vm10 }
 0x1ea   :  { %v242_v19 = vsub.f32 1.0, %v241_v18 }
 0x1ec   :  { %v243_v21 = vmul.f32 %v299_v17, %v242_v19 }
 0x1ee   :  { %v244_v23 = vadd.f32 %v299_v17, %v243_v21 }
 0x1f0   :  { %v248_v25 = vsel %vm247_vm12, %v299_v17, %v244_v23 }
 0x1f1   :  { %v253_v26 = vsel %vm250_vm13, %v252_v24, %v248_v25 }
 0x1f2   :  { %v254_v27 = vmul.f32 %v297_v9, %v253_v26 }
 0x1f4   :  { %255 = vst.msk [vmem:[#allocation2] sm:$0xff] %vm57_vm0, %v254_v27 }
 0x1f5   :  { %266 = dma.vmem_to_hbm [thread:$0]  %s262_s11, 128, %s264_s14, [#allocation3]  }
 0x1f6   :  { %324 = dma.done.wait [#allocation3], 128  }
 0x1f7   :  { %325 = vsyncadd [#allocation3], 4294967168 }
 0x1f8   :  { %271 = vsyncpa [#allocation3], 1 }

</bundles_post_ra>
